<compile_context>
chip_gen: v5e
topology: v5e:2x2
jax: 0.10.0
libtpu: 0.0.40
codegen_flags: <defaults>
</compile_context>

<pallas_src>
import functools

import jax
import jax.numpy as jnp
from jax.experimental import pallas as pl
from jax.experimental.pallas import tpu as pltpu


# ----------------------------------------------------------------------------
# Fused kernel: stem conv (im2col matmul, BN-scale pre-folded into weights)
# + shift + SiLU + global average pool + classifier head.
#   patches : (B, S, Kp) bf16   S = OH*OW, Kp = kh*kw*Cin padded to mult. of 32
#   w       : (Kp, Cf)   bf16   stem weight with gamma/sqrt(var+eps) folded in
#   shift   : (1, Cf)    f32    beta - mean * scale
#   fc_w    : (Cf, Np)   f32    head weight, out_dim lane-padded to Np=128k
#   fc_b    : (1, Np)    f32
#   logits  : (B, 1, Np) f32
# Grid = (B, S // TS).  CORRECTNESS: the spatial axis MUST stay the innermost
# grid axis and MUST stay "arbitrary" -- the pooled accumulator and the
# resident logits block depend on it (re-init at si == 0 per batch).
# ----------------------------------------------------------------------------
def stem_pool_head_kernel(patches_ref, w_ref, shift_ref, fcw_ref, fcb_ref,
                          logits_ref, acc_ref, *, inv_s):
    si = pl.program_id(1)

    @pl.when(si == 0)
    def _init():
        acc_ref[...] = jnp.zeros_like(acc_ref)

    x = patches_ref[0]                                     # (TS, Kp) bf16
    # Kp = 27 -> 32 pads to the MXU contraction depth; acceptable for the stem
    # (this kernel is epilogue-bound, not MXU- or HBM-bound at these sizes).
    y = jnp.dot(x, w_ref[...], preferred_element_type=jnp.float32)  # (TS, Cf)
    y = y + shift_ref[...]                                 # folded-BN shift
    # SiLU with a single EUP op: x * sigmoid(x) = x * 0.5 * (1 + tanh(x/2)).
    y = y * (0.5 * (jnp.tanh(0.5 * y) + 1.0))
    ts, cf = y.shape
    # Pool partial sums as plain vreg adds into an (8, Cf) accumulator; the
    # cross-sublane (XLU) reduction happens once in finalize.
    acc_ref[...] += jnp.sum(y.reshape(ts // 8, 8, cf), axis=0)

    @pl.when(si == pl.num_programs(1) - 1)
    def _finalize():
        # Fused head: (sum_s acc[s]) @ W == sum_s (acc[s] @ W); keep the
        # matmul (8, Cf) x (Cf, Np) shaped, reduce sublanes after, then apply
        # the 1/S mean scale and the bias.  Dropout(0.5) is identity at
        # inference; squeeze(-1).squeeze(-1) is a no-op on pooled features.
        part = jnp.dot(acc_ref[...], fcw_ref[...],
                       preferred_element_type=jnp.float32)          # (8, Np)
        logits_ref[0] = (jnp.sum(part, axis=0, keepdims=True) * inv_s
                         + fcb_ref[...])


# ----------------------------------------------------------------------------
# im2col patch extraction (layout plumbing, plain JAX, done in bf16 so the
# expanded tensor is written once at half width).  Produces (B, S, Kp) with
# K padded up to a multiple of 32 for clean sublane layout.
# ----------------------------------------------------------------------------
def im2col_nhwc(x_nhwc, ksize=3, stride=2, pad=1):
    B, H, W, C = x_nhwc.shape
    xp = jnp.pad(x_nhwc, ((0, 0), (pad, pad), (pad, pad), (0, 0)))
    OH = (H + 2 * pad - ksize) // stride + 1
    OW = (W + 2 * pad - ksize) // stride + 1
    pieces = []
    for i in range(ksize):
        for j in range(ksize):
            pieces.append(xp[:, i:i + stride * OH:stride,
                             j:j + stride * OW:stride, :])
    p = jnp.concatenate(pieces, axis=-1)          # (B, OH, OW, kh*kw*C)
    K = ksize * ksize * C
    Kp = ((K + 31) // 32) * 32
    if Kp > K:
        p = jnp.pad(p, ((0, 0), (0, 0), (0, 0), (0, Kp - K)))
    patches = p.reshape(B, OH * OW, Kp)
    return patches, OH, OW, Kp


def _pick_s_tile(s, max_tile=2048):
    """Largest spatial tile (multiple of 8) <= max_tile dividing S, preferring
    >= 2 tiles so the pipelined accumulate path is exercised.  For real B6
    spatial extents (S ~ 70K) sweep max_tile up to 8192 (VMEM is not the
    constraint; raise vmem_limit_bytes if the scoped default is exceeded)."""
    for cand in (max_tile, 1024, 512, 256, 128, 64, 32, 16, 8):
        if cand <= s // 2 and s % cand == 0:
            return cand
    return s


def enetv2_forward(x_nchw, params):
    """x_nchw: (B, 3, H, W) float32 -> logits (B, out_dim)."""
    B = x_nchw.shape[0]
    # NCHW -> NHWC, cast to bf16 BEFORE im2col so the 9x-expanded patch tensor
    # is built (and read by the kernel) in bf16 with no separate cast pass.
    x = jnp.transpose(x_nchw, (0, 2, 3, 1)).astype(jnp.bfloat16)

    patches, OH, OW, Kp = im2col_nhwc(x)          # (B, S, Kp) bf16
    S = OH * OW
    K, Cf = params["stem_w"].shape
    out_dim = params["fc_w"].shape[1]

    # Fold the BN scale into the conv weight columns (f32), pad K -> Kp with
    # inert zero rows, then cast to bf16 for the MXU.
    w_scaled = params["stem_w"] * params["bn_scale"]            # (K, Cf) f32
    w_bf16 = jnp.pad(w_scaled, ((0, Kp - K), (0, 0))).astype(jnp.bfloat16)

    # Lane-pad the head so the logits store is unmasked (full 128 lanes).
    n_pad = ((out_dim + 127) // 128) * 128
    fc_w_pad = jnp.pad(params["fc_w"], ((0, 0), (0, n_pad - out_dim)))
    fc_b_pad = jnp.pad(params["fc_b"], ((0, 0), (0, n_pad - out_dim)))

    ts = _pick_s_tile(S)
    assert S % ts == 0 and ts % 8 == 0, (S, ts)
    n_s_tiles = S // ts

    logits3 = pl.pallas_call(
        functools.partial(stem_pool_head_kernel, inv_s=1.0 / S),
        out_shape=jax.ShapeDtypeStruct((B, 1, n_pad), jnp.float32),
        grid=(B, n_s_tiles),
        in_specs=[
            pl.BlockSpec((1, ts, Kp), lambda b, s: (b, s, 0)),
            pl.BlockSpec((Kp, Cf), lambda b, s: (0, 0)),
            pl.BlockSpec((1, Cf), lambda b, s: (0, 0)),
            pl.BlockSpec((Cf, n_pad), lambda b, s: (0, 0)),
            pl.BlockSpec((1, n_pad), lambda b, s: (0, 0)),
        ],
        out_specs=pl.BlockSpec((1, 1, n_pad), lambda b, s: (b, 0, 0)),
        scratch_shapes=[pltpu.VMEM((8, Cf), jnp.float32)],
        compiler_params=pltpu.CompilerParams(
            dimension_semantics=("parallel", "arbitrary")),
    )(patches, w_bf16, params["bn_shift"], fc_w_pad, fc_b_pad)

    return logits3.reshape(B, n_pad)[:, :out_dim]


def reference_forward(x_nchw, params):
    """Pure-JAX reference (same bf16 operands / folded scale / tanh-SiLU)."""
    x = jnp.transpose(x_nchw, (0, 2, 3, 1)).astype(jnp.bfloat16)
    patches, OH, OW, Kp = im2col_nhwc(x)
    B, S, _ = patches.shape
    K, Cf = params["stem_w"].shape
    w_scaled = params["stem_w"] * params["bn_scale"]
    w_bf16 = jnp.pad(w_scaled, ((0, Kp - K), (0, 0))).astype(jnp.bfloat16)
    y = jnp.dot(patches.reshape(B * S, Kp), w_bf16,
                preferred_element_type=jnp.float32)
    y = y + params["bn_shift"]
    y = y * (0.5 * (jnp.tanh(0.5 * y) + 1.0))            # SiLU (tanh form)
    pooled = y.reshape(B, S, Cf).mean(axis=1)
    return pooled @ params["fc_w"] + params["fc_b"]


def init_params(key, cin=3, ksize=3, cf=128, out_dim=9):
    # cf=128 keeps the stem width lane-aligned (real B6 stem width is 56).
    k1, k2, k3, k4, k5 = jax.random.split(key, 5)
    K = ksize * ksize * cin
    stem_w = 0.1 * jax.random.normal(k1, (K, cf), dtype=jnp.float32)
    gamma = 1.0 + 0.01 * jax.random.normal(k2, (1, cf), dtype=jnp.float32)
    beta = 0.01 * jax.random.normal(k3, (1, cf), dtype=jnp.float32)
    # folded BN stats (mean=0, var=1, eps=1e-3)
    scale = gamma / jnp.sqrt(1.0 + 1e-3)
    shift = beta
    fc_w = 0.05 * jax.random.normal(k4, (cf, out_dim), dtype=jnp.float32)
    fc_b = 0.01 * jax.random.normal(k5, (1, out_dim), dtype=jnp.float32)
    return {"stem_w": stem_w, "bn_scale": scale, "bn_shift": shift,
            "fc_w": fc_w, "fc_b": fc_b}


if __name__ == "__main__":
    key = jax.random.PRNGKey(0)
    kp, kx = jax.random.split(key)
    params = init_params(kp, cin=3, ksize=3, cf=128, out_dim=9)

    # small NCHW image input, consistent with the module's forward
    x = jax.random.normal(kx, (2, 3, 32, 32), dtype=jnp.float32)

    out = jax.block_until_ready(enetv2_forward(x, params))
    ref = jax.block_until_ready(reference_forward(x, params))

    assert out.shape == (2, 9), out.shape
    assert jnp.allclose(out, ref, atol=5e-3, rtol=5e-3), "mismatch vs reference"
    print("KERNEL_OK")
</pallas_src>

<mosaic_0001>
module attributes {stable_mosaic.version = 11 : i64} {
  func.func @stem_pool_head_kernel(%arg0: i32, %arg1: i32, %arg2: memref<1x128x32xbf16, #tpu.memory_space<vmem>>, %arg3: memref<32x128xbf16, #tpu.memory_space<vmem>>, %arg4: memref<1x128xf32, #tpu.memory_space<vmem>>, %arg5: memref<128x128xf32, #tpu.memory_space<vmem>>, %arg6: memref<1x128xf32, #tpu.memory_space<vmem>>, %arg7: memref<1x1x128xf32, #tpu.memory_space<vmem>>, %arg8: memref<8x128xf32, #tpu.memory_space<vmem>>) attributes {dimension_semantics = [#tpu.dimension_semantics<parallel>, #tpu.dimension_semantics<arbitrary>], iteration_bounds = array<i64: 2, 2>, scalar_prefetch = 0 : i64, scratch_operands = 1 : i64, tpu.core_type = #tpu.core_type<tc>, window_params = [{transform_indices = @transform_0, window_bounds = array<i64: 1, 128, 32>}, {pipeline_mode = #tpu.pipeline_mode<synchronous>, transform_indices = @transform_1, window_bounds = array<i64: 32, 128>}, {pipeline_mode = #tpu.pipeline_mode<synchronous>, transform_indices = @transform_2, window_bounds = array<i64: 1, 128>}, {pipeline_mode = #tpu.pipeline_mode<synchronous>, transform_indices = @transform_3, window_bounds = array<i64: 128, 128>}, {pipeline_mode = #tpu.pipeline_mode<synchronous>, transform_indices = @transform_4, window_bounds = array<i64: 1, 128>}, {transform_indices = @transform_5, window_bounds = array<i64: 1, 1, 128>}]} {
    %c0_i32 = arith.constant 0 : i32
    %0 = arith.cmpi eq, %arg1, %c0_i32 : i32
    %1 = arith.extui %0 : i1 to i32
    %c0_i32_0 = arith.constant 0 : i32
    %2 = arith.cmpi ne, %1, %c0_i32_0 : i32
    scf.if %2 {
      %cst_16 = arith.constant 0.000000e+00 : f32
      %26 = vector.broadcast %cst_16 : f32 to vector<8x128xf32>
      %c0_17 = arith.constant 0 : index
      %c0_18 = arith.constant 0 : index
      %27 = vector.load %arg8[%c0_17, %c0_18] : memref<8x128xf32, #tpu.memory_space<vmem>>, vector<8x128xf32>
      tpu.vector_store %arg8[%c0_17, %c0_18], %26 {strides = array<i32>} : memref<8x128xf32, #tpu.memory_space<vmem>>, vector<8x128xf32>,
    } else {
    }
    %c0 = arith.constant 0 : index
    %c0_1 = arith.constant 0 : index
    %c0_2 = arith.constant 0 : index
    %3 = vector.load %arg2[%c0, %c0_1, %c0_2] : memref<1x128x32xbf16, #tpu.memory_space<vmem>>, vector<1x128x32xbf16>
    %4 = vector.shape_cast %3 : vector<1x128x32xbf16> to vector<128x32xbf16>
    %c0_3 = arith.constant 0 : index
    %c0_4 = arith.constant 0 : index
    %5 = vector.load %arg3[%c0_3, %c0_4] : memref<32x128xbf16, #tpu.memory_space<vmem>>, vector<32x128xbf16>
    %cst = arith.constant dense<0.000000e+00> : vector<128x128xf32>
    %6 = tpu.matmul %4, %5, %cst {dimension_numbers = #tpu.dot_dimension_numbers<[1], [0], [0], [1], [0, 0, 1, 1], [], []>} : vector<128x32xbf16>, vector<32x128xbf16>, vector<128x128xf32> -> vector<128x128xf32>
    %c0_5 = arith.constant 0 : index
    %c0_6 = arith.constant 0 : index
    %7 = vector.load %arg4[%c0_5, %c0_6] : memref<1x128xf32, #tpu.memory_space<vmem>>, vector<1x128xf32>
    %8 = vector.broadcast %7 : vector<1x128xf32> to vector<128x128xf32>
    %9 = arith.addf %6, %8 : vector<128x128xf32>
    %cst_7 = arith.constant 5.000000e-01 : f32
    %10 = vector.broadcast %cst_7 : f32 to vector<128x128xf32>
    %11 = arith.mulf %10, %9 : vector<128x128xf32>
    %12 = math.tanh %11 : vector<128x128xf32>
    %cst_8 = arith.constant 1.000000e+00 : f32
    %13 = vector.broadcast %cst_8 : f32 to vector<128x128xf32>
    %14 = arith.addf %12, %13 : vector<128x128xf32>
    %cst_9 = arith.constant 5.000000e-01 : f32
    %15 = vector.broadcast %cst_9 : f32 to vector<128x128xf32>
    %16 = arith.mulf %15, %14 : vector<128x128xf32>
    %17 = arith.mulf %9, %16 : vector<128x128xf32>
    %c0_10 = arith.constant 0 : index
    %c0_11 = arith.constant 0 : index
    %18 = vector.load %arg8[%c0_10, %c0_11] : memref<8x128xf32, #tpu.memory_space<vmem>>, vector<8x128xf32>
    %19 = vector.shape_cast %17 : vector<128x128xf32> to vector<16x8x128xf32>
    %cst_12 = arith.constant dense<0.000000e+00> : vector<8x128xf32>
    %20 = vector.multi_reduction <add>, %19, %cst_12 [0] : vector<16x8x128xf32> to vector<8x128xf32>
    %21 = arith.addf %18, %20 : vector<8x128xf32>
    %c0_13 = arith.constant 0 : index
    %c0_14 = arith.constant 0 : index
    %22 = vector.load %arg8[%c0_13, %c0_14] : memref<8x128xf32, #tpu.memory_space<vmem>>, vector<8x128xf32>
    tpu.vector_store %arg8[%c0_13, %c0_14], %21 {strides = array<i32>} : memref<8x128xf32, #tpu.memory_space<vmem>>, vector<8x128xf32>,
    %c1_i32 = arith.constant 1 : i32
    %23 = arith.cmpi eq, %arg1, %c1_i32 : i32
    %24 = arith.extui %23 : i1 to i32
    %c0_i32_15 = arith.constant 0 : i32
    %25 = arith.cmpi ne, %24, %c0_i32_15 : i32
    scf.if %25 {
      %c0_16 = arith.constant 0 : index
      %c0_17 = arith.constant 0 : index
      %26 = vector.load %arg8[%c0_16, %c0_17] : memref<8x128xf32, #tpu.memory_space<vmem>>, vector<8x128xf32>
      %c0_18 = arith.constant 0 : index
      %c0_19 = arith.constant 0 : index
      %27 = vector.load %arg5[%c0_18, %c0_19] : memref<128x128xf32, #tpu.memory_space<vmem>>, vector<128x128xf32>
      %cst_20 = arith.constant dense<0.000000e+00> : vector<8x128xf32>
      %28 = tpu.matmul %26, %27, %cst_20 {dimension_numbers = #tpu.dot_dimension_numbers<[1], [0], [0], [1], [0, 0, 1, 1], [], []>} : vector<8x128xf32>, vector<128x128xf32>, vector<8x128xf32> -> vector<8x128xf32>
      %cst_21 = arith.constant dense<0.000000e+00> : vector<128xf32>
      %29 = vector.multi_reduction <add>, %28, %cst_21 [0] : vector<8x128xf32> to vector<128xf32>
      %30 = vector.shape_cast %29 : vector<128xf32> to vector<1x128xf32>
      %cst_22 = arith.constant 3.906250e-03 : f32
      %31 = vector.broadcast %cst_22 : f32 to vector<1x128xf32>
      %32 = arith.mulf %30, %31 : vector<1x128xf32>
      %c0_23 = arith.constant 0 : index
      %c0_24 = arith.constant 0 : index
      %33 = vector.load %arg6[%c0_23, %c0_24] : memref<1x128xf32, #tpu.memory_space<vmem>>, vector<1x128xf32>
      %34 = arith.addf %32, %33 : vector<1x128xf32>
      %c0_25 = arith.constant 0 : index
      %c0_26 = arith.constant 0 : index
      %c0_27 = arith.constant 0 : index
      %35 = vector.load %arg7[%c0_25, %c0_26, %c0_27] : memref<1x1x128xf32, #tpu.memory_space<vmem>>, vector<1x1x128xf32>
      %36 = vector.shape_cast %35 : vector<1x1x128xf32> to vector<1x128xf32>
      %37 = vector.shape_cast %34 : vector<1x128xf32> to vector<1x1x128xf32>
      tpu.vector_store %arg7[%c0_25, %c0_26, %c0_27], %37 {strides = array<i32>} : memref<1x1x128xf32, #tpu.memory_space<vmem>>, vector<1x1x128xf32>,
    } else {
    }
    return
  }
  func.func @transform_0(%arg0: i32, %arg1: i32) -> (i32, i32, i32) {
    %c0_i32 = arith.constant 0 : i32
    %c0_i32_0 = arith.constant 0 : i32
    return %arg0, %arg1, %c0_i32 : i32, i32, i32
  }
  func.func @transform_1(%arg0: i32, %arg1: i32) -> (i32, i32) {
    %c0_i32 = arith.constant 0 : i32
    %c0_i32_0 = arith.constant 0 : i32
    %c0_i32_1 = arith.constant 0 : i32
    return %c0_i32, %c0_i32_0 : i32, i32
  }
  func.func @transform_2(%arg0: i32, %arg1: i32) -> (i32, i32) {
    %c0_i32 = arith.constant 0 : i32
    %c0_i32_0 = arith.constant 0 : i32
    %c0_i32_1 = arith.constant 0 : i32
    return %c0_i32, %c0_i32_0 : i32, i32
  }
  func.func @transform_3(%arg0: i32, %arg1: i32) -> (i32, i32) {
    %c0_i32 = arith.constant 0 : i32
    %c0_i32_0 = arith.constant 0 : i32
    %c0_i32_1 = arith.constant 0 : i32
    return %c0_i32, %c0_i32_0 : i32, i32
  }
  func.func @transform_4(%arg0: i32, %arg1: i32) -> (i32, i32) {
    %c0_i32 = arith.constant 0 : i32
    %c0_i32_0 = arith.constant 0 : i32
    %c0_i32_1 = arith.constant 0 : i32
    return %c0_i32, %c0_i32_0 : i32, i32
  }
  func.func @transform_5(%arg0: i32, %arg1: i32) -> (i32, i32, i32) {
    %c0_i32 = arith.constant 0 : i32
    %c0_i32_0 = arith.constant 0 : i32
    %c0_i32_1 = arith.constant 0 : i32
    return %arg0, %c0_i32, %c0_i32_0 : i32, i32, i32
  }
}

</mosaic_0001>

<bundles_post_ra>
// kernel: tpu_custom_call.1
= control target key start
LH: loop header
LB: loop body
LE: loop exit
PB: predicated region body
PF: predicated region fallthrough
CT: control target
= control target key end

     0   :  { %10 = vsyncpa [#allocation4], 0  ;;  %s1206_s0 = inlined_call_operand.vmem [shape: bf16[2,256,32], index: 0, kind: input, shape index: {}]   ;;  %s1207_s1 = inlined_call_operand.vmem [shape: bf16[32,128], index: 1, kind: input, shape index: {}]   ;;  %s1208_s2 = inlined_call_operand.vmem [shape: f32[1,128], index: 2, kind: input, shape index: {}]   ;;  %s1209_s3 = inlined_call_operand.vmem [shape: f32[128,128], index: 3, kind: input, shape index: {}]   ;;  %s1210_s4 = inlined_call_operand.vmem [shape: f32[1,128], index: 4, kind: input, shape index: {}]   ;;  %s1211_s5 = inlined_call_operand.hbm [shape: f32[2,1,128], index: 5, kind: output, shape index: {}]  }
   0x1   :  { %12 = vsyncpa [#allocation4 + $0x1], 0  ;;  %s948_s18 = smov 0   ;;  %s950_s19 = smov 0  }
   0x2   :  { %s952_s20 = smov 0   ;;  %s954_s21 = smov 0  }
   0x3   :  { %s956_s22 = smov 0   ;;  %s958_s23 = smov 0  }
   0x4   :  { %s960_s24 = smov 0   ;;  %s962_s25 = smov 0  }
   0x5 LB: > { %s640_s26 = sadd.s32 4294967295, %s915_s25   ;;  %s641_s27 = sadd.s32 4294967294, %s915_s25   ;;  %s915_s25 = sphi %s962_s25, %s18_s25   ;;  %s911_s24 = sphi %s960_s24, %s1220_s24   ;;  %s907_s23 = sphi %s958_s23, %s1219_s23   ;;  %s903_s22 = sphi %s956_s22, %s1218_s22   ;;  %s899_s21 = sphi %s954_s21, %s1217_s21   ;;  %s895_s20 = sphi %s952_s20, %s1216_s20   ;;  %s891_s19 = sphi %s950_s19, %s1215_s19   ;;  %s887_s18 = sphi %s948_s18, %s1214_s18  }
   0x6   : > { %s27_s28 = sadd.s32 1, %s907_s23  ;;  %s30_s29 = sadd.s32 1, %s911_s24 }
   0x7   : > { %p28_p0 = scmp.ge.s32.totalorder %s27_s28, 2  ;;  %p159_p1 = scmp.ne.s32.totalorder %s895_s20, %s891_s19 }
   0x8   : > { %p160_p2 = scmp.eq.s32.totalorder %s640_s26, 3  ;;  %p165_p4 = scmp.ne.s32.totalorder %s891_s19, %s887_s18 }
   0x9   : > { %s1222_s28 = smov (%p28_p0, %s27_s28), 0  ;;  %s1224_s29 = smov (!%p28_p0, %s30_s29), %s911_s24 }
   0xa   : > { %p997_p3 = por %p160_p2, %p159_p1  ;;  %p32_p5 = scmp.ge.s32.totalorder %s1224_s29, 2 }
   0xb   : > { %p166_p6 = scmp.eq.s32.totalorder %s641_s27, 3  ;;  %p644_p7 = scmp.ge.s32.totalorder %s915_s25, 1 }
   0xc   : > { %p209_p8 = scmp.lt.s32.totalorder %s915_s25, 5  ;;  %s1226_s29 = smov (%p32_p5, %s1224_s29), 0 }
   0xd   : > { %p1007_p9 = por %p166_p6, %p165_p4  ;;  %s146_s7 = ssub.s32 %s911_s24, %s1226_s29 }
   0xe   : > { %p210_p10 = pnand %p644_p7, %p209_p8  ;;  %s149_s8 = sadd.s32 1, %s895_s20 }
   0xf   : > { %p147_p11 = scmp.eq.s32.totalorder %s146_s7, 0  ;;  %s238_s10 = sand.u32 (!%p210_p10), 1, %s891_s19  }
  0x10   : > { %213 = sbr.rel (%p210_p10) target bundleno = 422 (0x1a6), region = 40  ;;  %s645_s11 = sshll.u32 (!%p210_p10), %s899_s21, 4 }
  0x11   : > { %s1015_s9 = scalar_select %p147_p11, %s895_s20, %s149_s8  }
  0x12   : > { %p241_p12 = scmp.lt.s32.totalorder (!%p210_p10), %s903_s22, 1  ;;  %p243_p13 = scmp.lt.s32.totalorder (!%p210_p10), %s645_s11, 31 }
  0x13   : > { %s1026_s27 = scalar_lea.vmem (!%p210_p10), [#allocation3], %s238_s10  ;;  %p648_p0 = scmp.ne.s32.totalorder (!%p210_p10), %s899_s21, 0 }
  0x15   : > { %s242_s12 = scalar_select %p241_p12, %s903_s22, 1 }
  0x16   : > { %s1228_s11 = smov (!%p243_p13, %s645_s11), 31  ;;  %254 = sbr.rel (%p648_p0) target bundleno = 29 (0x1d), region = 44 }
  0x17   : > { %s646_s13 = sshll.u32 %s242_s12, 5 }
  0x18   : > { %s246_s14 = sadd.s32 %s646_s13, %s1228_s11 }
  0x19   : > { %s647_s15 = sshll.u32 %s246_s14, 2 }
  0x1a   : > { %s248_s26 = scalar_lea.vmem %s1206_s0, %s647_s15 }
  0x1b   : > { %v917_v0 = vmov 0.0  }
  0x1c   : > { %255 = vst [vmem:[#allocation2] sm:$0xff] %v917_v0 }
  0x1d PF: > { %v709_v1 = vld [vmem:[%s1207_s1 + $0x8] sm:$0xff]  ;;  %v708_v2 = vld [vmem:[%s1207_s1] sm:$0xff]  ;;  %v702_v4 = vld [vmem:[%s248_s26 + $0x10] sm:$0xff]  ;;  %vm332_vm0 = vcmask 261120   ;;  %p697_p1 = scmp.ne.s32.totalorder %s899_s21, 1 }
  0x1e   : > { %363 = vmatpush.bf16.msra.mxu0 %v709_v1  ;;  %710 = vmatpush.bf16.msra.mxu1 %v709_v1  ;;  %v700_v3 = vld [vmem:[%s248_s26] sm:$0xff]  ;;  %v706_v6 = vld [vmem:[%s248_s26 + $0x30] sm:$0xff]  ;;  %v701_v7 = vld [vmem:[%s248_s26 + $0x8] sm:$0xff] }
  0x1f   : > { %711 = vmatpush.bf16.msra.mxu2 %v709_v1  ;;  %712 = vmatpush.bf16.msra.mxu3 %v709_v1  ;;  %v704_v5 = vld [vmem:[%s248_s26 + $0x20] sm:$0xff]  ;;  %v703_v8 = vld [vmem:[%s248_s26 + $0x18] sm:$0xff]  ;;  %v705_v9 = vld [vmem:[%s248_s26 + $0x28] sm:$0xff] }
  0x20   : > { %v707_v10 = vld [vmem:[%s248_s26 + $0x38] sm:$0xff]  ;;  %v1046_v15 = vld [vmem:[%s1208_s2] ss:$0 sm:$0xff] }
  0x22   : > { %364 = vmatpush.bf16.msra.mxu0 %v708_v2  ;;  %713 = vmatpush.bf16.msra.mxu1 %v708_v2 }
  0x23   : > { %714 = vmatpush.bf16.msra.mxu2 %v708_v2  ;;  %715 = vmatpush.bf16.msra.mxu3 %v708_v2 }
  0x25   : > { %689 = vmatmul.msk.bf16.vlgmr.msra.gmra.mxu0 %vm332_vm0, %v700_v3  ;;  %691 = vmatmul.msk.bf16.vlgmr.msra.gmra.mxu1 %vm332_vm0, %v702_v4 }
  0x26   : > { %693 = vmatmul.msk.bf16.vlgmr.msra.gmra.mxu2 %vm332_vm0, %v704_v5  ;;  %695 = vmatmul.msk.bf16.vlgmr.msra.gmra.mxu3 %vm332_vm0, %v706_v6 }
  0x35   : > { %690 = vmatmul.msk.bf16.gmra.mxu0 %vm332_vm0, %v701_v7  ;;  %692 = vmatmul.msk.bf16.gmra.mxu1 %vm332_vm0, %v703_v8 }
  0x36   : > { %694 = vmatmul.msk.bf16.gmra.mxu2 %vm332_vm0, %v705_v9  ;;  %696 = vmatmul.msk.bf16.gmra.mxu3 %vm332_vm0, %v707_v10 }
  0xa2   : > { %v366_v11 = vpop.f32.mrf.mxu0  ;;  %v376_v12 = vpop.f32.mrf.mxu1 }
  0xa3   : > { %v367_v19 = vadd.f32 %v1046_v15, %v366_v11  ;;  %v1052_v27 = vadd.f32 %v1046_v15, %v376_v12 }
  0xa5   : > { %v406_v22 = vmul.f32 0.5, %v367_v19  ;;  %v410_v31 = vmul.f32 0.5, %v1052_v27 }
  0xa9   : > { %v386_v13 = vpop.f32.mrf.mxu2  ;;  %v396_v14 = vpop.f32.mrf.mxu3 }
  0xaa   : > { %v368_v16 = vpop.f32.mrf.mxu0  ;;  %v378_v17 = vpop.f32.mrf.mxu1  ;;  %v1068_v41 = vadd.f32 %v1046_v15, %v386_v13  ;;  %v1083_v60 = vadd.f32 %v1046_v15, %v396_v14 }
  0xab   : > { %v369_v18 = vadd.f32 %v1046_v15, %v368_v16  ;;  %v1055_v29 = vadd.f32 %v1046_v15, %v378_v17 }
  0xac   : > { %v414_v50 = vmul.f32 0.5, %v1068_v41  ;;  %v418_v10 = vmul.f32 0.5, %v1083_v60 }
  0xad   : > { %v407_v20 = vmul.f32 0.5, %v369_v18  ;;  %v411_v34 = vmul.f32 0.5, %v1055_v29 }
  0xaf   : > { %789 = vtanh.f32 %v407_v20 }
  0xb0   : > { %791 = vtanh.f32 %v406_v22 }
  0xb1   : > { %v388_v21 = vpop.f32.mrf.mxu2  ;;  %v398_v25 = vpop.f32.mrf.mxu3 }
  0xb2   : > { %v371_v23 = vpop.f32.mrf.mxu0  ;;  %v381_v24 = vpop.f32.mrf.mxu1  ;;  %v1071_v46 = vadd.f32 %v1046_v15, %v388_v21  ;;  %v1087_v2 = vadd.f32 %v1046_v15, %v398_v25 }
  0xb3   : > { %v372_v26 = vadd.f32 %v1046_v15, %v371_v23  ;;  %v1058_v30 = vadd.f32 %v1046_v15, %v381_v24 }
  0xb4   : > { %v415_v55 = vmul.f32 0.5, %v1071_v46 }
  0xb5   : > { %v408_v28 = vmul.f32 0.5, %v372_v26  ;;  %v790_v33 = vpop.eup %789  ;;  %v412_v37 = vmul.f32 0.5, %v1058_v30 }
  0xb6   : > { %v792_v40 = vpop.eup %791  ;;  %v439_v42 = vadd.f32 1.0, %v790_v33 }
  0xb7   : > { %793 = vtanh.f32 %v408_v28  ;;  %v438_v48 = vadd.f32 1.0, %v792_v40 }
  0xb8   : > { %795 = vtanh.f32 %v410_v31  ;;  %v455_v52 = vmul.f32 0.5, %v439_v42 }
  0xb9   : > { %v391_v32 = vpop.f32.mrf.mxu2  ;;  %v401_v43 = vpop.f32.mrf.mxu3  ;;  %797 = vtanh.f32 %v411_v34  ;;  %v454_v57 = vmul.f32 0.5, %v438_v48 }
  0xba   : > { %v373_v35 = vpop.f32.mrf.mxu0  ;;  %v383_v36 = vpop.f32.mrf.mxu1  ;;  %799 = vtanh.f32 %v412_v37  ;;  %v1076_v51 = vadd.f32 %v1046_v15, %v391_v32  ;;  %v471_v0 = vmul.f32 %v455_v52, %v369_v18  ;;  %v1092_v11 = vadd.f32 %v1046_v15, %v401_v43 }
  0xbb   : > { %v374_v38 = vadd.f32 %v1046_v15, %v373_v35  ;;  %v1065_v39 = vadd.f32 %v1046_v15, %v383_v36  ;;  %v470_v4 = vmul.f32 %v454_v57, %v367_v19  ;;  %v419_v18 = vmul.f32 0.5, %v1087_v2 }
  0xbc   : > { %v416_v61 = vmul.f32 0.5, %v1076_v51  ;;  %v420_v25 = vmul.f32 0.5, %v1092_v11 }
  0xbd   : > { %v409_v44 = vmul.f32 0.5, %v374_v38  ;;  %v794_v45 = vpop.eup %793  ;;  %v413_v47 = vmul.f32 0.5, %v1065_v39  ;;  %v487_v13 = vadd.f32 %v471_v0, %v470_v4 }
  0xbe   : > { %v440_v49 = vadd.f32 1.0, %v794_v45  ;;  %v796_v54 = vpop.eup %795 }
  0xbf   : > { %801 = vtanh.f32 %v409_v44  ;;  %v798_v59 = vpop.eup %797  ;;  %v442_v63 = vadd.f32 1.0, %v796_v54 }
  0xc0   : > { %803 = vtanh.f32 %v413_v47  ;;  %v456_v58 = vmul.f32 0.5, %v440_v49  ;;  %v800_v62 = vpop.eup %799  ;;  %v443_v5 = vadd.f32 1.0, %v798_v59 }
  0xc1   : > { %v393_v53 = vpop.f32.mrf.mxu2  ;;  %805 = vtanh.f32 %v414_v50  ;;  %v403_v8 = vpop.f32.mrf.mxu3  ;;  %v458_v12 = vmul.f32 0.5, %v442_v63  ;;  %v444_v14 = vadd.f32 1.0, %v800_v62 }
  0xc2   : > { %v1080_v56 = vadd.f32 %v1046_v15, %v393_v53  ;;  %807 = vtanh.f32 %v415_v55  ;;  %v472_v6 = vmul.f32 %v456_v58, %v372_v26  ;;  %v404_v19 = vadd.f32 %v1046_v15, %v403_v8 }
  0xc3   : > { %809 = vtanh.f32 %v416_v61  ;;  %v459_v20 = vmul.f32 0.5, %v443_v5  ;;  %v474_v26 = vmul.f32 %v458_v12, %v1052_v27  ;;  %v460_v31 = vmul.f32 0.5, %v444_v14  ;;  %v486_v14 = vld [vmem:[#allocation2] sm:$0xff] }
  0xc4   : > { %v417_v3 = vmul.f32 0.5, %v1080_v56  ;;  %v488_v21 = vadd.f32 %v487_v13, %v472_v6  ;;  %v421_v34 = vmul.f32 0.5, %v404_v19 }
  0xc5   : > { %v802_v1 = vpop.eup %801  ;;  %v475_v35 = vmul.f32 %v459_v20, %v1055_v29  ;;  %v476_v42 = vmul.f32 %v460_v31, %v1058_v30 }
  0xc6   : > { %v441_v7 = vadd.f32 1.0, %v802_v1  ;;  %v804_v9 = vpop.eup %803  ;;  %811 = vtanh.f32 %v417_v3 }
  0xc7   : > { %v806_v17 = vpop.eup %805  ;;  %v445_v23 = vadd.f32 1.0, %v804_v9  ;;  %813 = vtanh.f32 %v418_v10 }
  0xc8   : > { %v457_v16 = vmul.f32 0.5, %v441_v7  ;;  %v808_v24 = vpop.eup %807  ;;  %v446_v28 = vadd.f32 1.0, %v806_v17  ;;  %815 = vtanh.f32 %v419_v18 }
  0xc9   : > { %v810_v33 = vpop.eup %809  ;;  %v447_v36 = vadd.f32 1.0, %v808_v24  ;;  %v461_v37 = vmul.f32 0.5, %v445_v23  ;;  %817 = vtanh.f32 %v420_v25 }
  0xca   : > { %v473_v22 = vmul.f32 %v457_v16, %v374_v38  ;;  %v462_v38 = vmul.f32 0.5, %v446_v28  ;;  %v448_v43 = vadd.f32 1.0, %v810_v33  ;;  %819 = vtanh.f32 %v421_v34 }
  0xcb   : > { %v463_v27 = vmul.f32 0.5, %v447_v36  ;;  %v477_v47 = vmul.f32 %v461_v37, %v1065_v39 }
  0xcc   : > { %v489_v32 = vadd.f32 %v488_v21, %v473_v22  ;;  %v812_v40 = vpop.eup %811  ;;  %v478_v29 = vmul.f32 %v462_v38, %v1068_v41  ;;  %v464_v53 = vmul.f32 0.5, %v448_v43 }
  0xcd   : > { %v814_v45 = vpop.eup %813  ;;  %v449_v49 = vadd.f32 1.0, %v812_v40  ;;  %v479_v57 = vmul.f32 %v463_v27, %v1071_v46 }
  0xce   : > { %v490_v15 = vadd.f32 %v489_v32, %v474_v26  ;;  %v816_v50 = vpop.eup %815  ;;  %v450_v52 = vadd.f32 1.0, %v814_v45  ;;  %v480_v63 = vmul.f32 %v464_v53, %v1076_v51 }
  0xcf   : > { %v818_v55 = vpop.eup %817  ;;  %v451_v58 = vadd.f32 1.0, %v816_v50  ;;  %v465_v59 = vmul.f32 0.5, %v449_v49 }
  0xd0   : > { %v491_v44 = vadd.f32 %v490_v15, %v475_v35  ;;  %v820_v61 = vpop.eup %819  ;;  %v466_v62 = vmul.f32 0.5, %v450_v52  ;;  %v452_v0 = vadd.f32 1.0, %v818_v55 }
  0xd1   : > { %v467_v1 = vmul.f32 0.5, %v451_v58  ;;  %v481_v3 = vmul.f32 %v465_v59, %v1080_v56  ;;  %v453_v41 = vadd.f32 1.0, %v820_v61 }
  0xd2   : > { %v492_v48 = vadd.f32 %v491_v44, %v476_v42  ;;  %v482_v5 = vmul.f32 %v466_v62, %v1083_v60  ;;  %v468_v6 = vmul.f32 0.5, %v452_v0 }
  0xd3   : > { %v483_v46 = vmul.f32 %v467_v1, %v1087_v2  ;;  %v469_v9 = vmul.f32 0.5, %v453_v41 }
  0xd4   : > { %v493_v54 = vadd.f32 %v492_v48, %v477_v47  ;;  %v484_v10 = vmul.f32 %v468_v6, %v1092_v11 }
  0xd5   : > { %v485_v13 = vmul.f32 %v469_v9, %v404_v19 }
  0xd6   : > { %v494_v30 = vadd.f32 %v493_v54, %v478_v29 }
  0xd8   : > { %v495_v39 = vadd.f32 %v494_v30, %v479_v57 }
  0xda   : > { %v496_v4 = vadd.f32 %v495_v39, %v480_v63 }
  0xdc   : > { %v497_v7 = vadd.f32 %v496_v4, %v481_v3 }
  0xde   : > { %v498_v8 = vadd.f32 %v497_v7, %v482_v5 }
  0xe0   : > { %v499_v12 = vadd.f32 %v498_v8, %v483_v46 }
  0xe2   : > { %v500_v51 = vadd.f32 %v499_v12, %v484_v10 }
  0xe4   : > { %v501_v16 = vadd.f32 %v500_v51, %v485_v13  ;;  %507 = sbr.rel (%p697_p1) target bundleno = 408 (0x198), region = 48 }
  0xe6   : > { %v502_v17 = vadd.f32 %v501_v16, %v486_v14 }
  0xe8   : > { %503 = vst [vmem:[#allocation2] sm:$0xff] %v502_v17 }
  0xe9   : > { %v524_v56 = vld [vmem:[%s1209_s3 + $0x78] sm:$0xff]  ;;  %v523_v60 = vld [vmem:[%s1209_s3 + $0x70] sm:$0xff]  ;;  %v522_v2 = vld [vmem:[%s1209_s3 + $0x68] sm:$0xff] }
  0xea   : > { %525 = vmatpush.msra.mxu0 %v524_v56  ;;  %v521_v11 = vld [vmem:[%s1209_s3 + $0x60] sm:$0xff]  ;;  %v520_v18 = vld [vmem:[%s1209_s3 + $0x58] sm:$0xff]  ;;  %v519_v19 = vld [vmem:[%s1209_s3 + $0x50] sm:$0xff] }
  0xeb   : > { %v518_v20 = vld [vmem:[%s1209_s3 + $0x48] sm:$0xff]  ;;  %v517_v21 = vld [vmem:[%s1209_s3 + $0x40] sm:$0xff]  ;;  %v516_v22 = vld [vmem:[%s1209_s3 + $0x38] sm:$0xff] }
  0xec   : > { %526 = vmatpush.msra.mxu0 %v523_v60  ;;  %v515_v23 = vld [vmem:[%s1209_s3 + $0x30] sm:$0xff]  ;;  %v514_v24 = vld [vmem:[%s1209_s3 + $0x28] sm:$0xff]  ;;  %v513_v25 = vld [vmem:[%s1209_s3 + $0x20] sm:$0xff] }
  0xed   : > { %v512_v26 = vld [vmem:[%s1209_s3 + $0x18] sm:$0xff]  ;;  %v511_v28 = vld [vmem:[%s1209_s3 + $0x10] sm:$0xff]  ;;  %v510_v31 = vld [vmem:[%s1209_s3 + $0x8] sm:$0xff] }
  0xee   : > { %527 = vmatpush.msra.mxu0 %v522_v2  ;;  %v509_v32 = vld [vmem:[%s1209_s3] sm:$0xff] }
  0xef   : > { %v508_v33 = vld [vmem:[#allocation2] sm:$0xff] }
  0xf0   : > { %528 = vmatpush.msra.mxu0 %v521_v11  ;;  %v552_v42 = vld [vmem:[%s1210_s4] sm:$0x1] }
  0xf2   : > { %529 = vmatpush.msra.mxu0 %v520_v18 }
  0xf4   : > { %530 = vmatpush.msra.mxu0 %v519_v19 }
  0xf6   : > { %531 = vmatpush.msra.mxu0 %v518_v20 }
  0xf8   : > { %532 = vmatpush.msra.mxu0 %v517_v21 }
  0xfa   : > { %533 = vmatpush.msra.mxu0 %v516_v22 }
  0xfc   : > { %534 = vmatpush.msra.mxu0 %v515_v23 }
  0xfe   : > { %535 = vmatpush.msra.mxu0 %v514_v24 }
 0x100   : > { %536 = vmatpush.msra.mxu0 %v513_v25 }
 0x102   : > { %537 = vmatpush.msra.mxu0 %v512_v26 }
 0x104   : > { %538 = vmatpush.msra.mxu0 %v511_v28 }
 0x106   : > { %539 = vmatpush.msra.mxu0 %v510_v31 }
 0x108   : > { %540 = vmatpush.msra.mxu0 %v509_v32 }
 0x109   : > { %541 = vmatmul.f32.vlgmr.msra.gmra.mxu0 %v508_v33 }
 0x186   : > { %v542_v34 = vpop.f32.mrf.mxu0 }
 0x187   : > { %v545_v35 = vrot.slane %v542_v34, 4 }
 0x189   : > { %v546_v36 = vadd.f32 %v545_v35, %v542_v34 }
 0x18b   : > { %v547_v15 = vrot.slane %v546_v36, 2 }
 0x18d   : > { %v548_v37 = vadd.f32 %v547_v15, %v546_v36 }
 0x18f   : > { %v549_v40 = vrot.slane %v548_v37, 1 }
 0x191   : > { %v550_v38 = vadd.f32 %v549_v40, %v548_v37 }
 0x193   : > { %v551_v43 = vmul.f32 0.00390625, %v550_v38 }
 0x195   : > { %v553_v44 = vadd.f32 %v552_v42, %v551_v43 }
 0x197   : > { %554 = vst [vmem:[%s1026_s27] sm:$0x1] %v553_v44 }
 0x198 PF: > { %s564_s26 = scalar_lea.hbm %s1211_s5, %s903_s22  ;;  %s566_s7 = sshll.u32 %s1026_s27, 4  ;;  %s567_s7 = int_to_ptr.vmem [resolvable:$true] %s566_s7 }
 0x199   : > { %s568_s8 = sshll.u32 %s564_s26, 4  ;;  %s556_s11 = scalar_lea.sflag [#allocation4], %s238_s10  ;;  %s569_s8 = int_to_ptr.hbm [resolvable:$true] %s568_s8 }
 0x19a   : > { %s835_s12 = sshra.s32 %s569_s8, 4  ;;  %s841_s15 = scalar_lea.hbm %s1211_s5, 2  ;;  %s836_s12 = int_to_ptr.hbm [resolvable:$true] %s835_s12 }
 0x19b   : > { %s837_s21 = scalar_lea.hbm %s836_s12, 1  ;;  %p842_p6 = scmp.lt.s32.totalorder %s836_s12, %s1211_s5 }
 0x19c   : > { %p838_p2 = scmp.ne.s32.totalorder %s836_s12, %s837_s21  ;;  %p843_p7 = scmp.lt.s32.totalorder %s841_s15, %s837_s21 }
 0x19e   : > { %p839_p4 = pnand %p838_p2, %p997_p3  ;;  %p844_p8 = por %p843_p7, %p842_p6 }
 0x1a0   : > { %p840_p5 = pneg %p839_p4 }
 0x1a2   : > { %p845_p10 = pnand %p844_p8, %p840_p5 }
 0x1a4   : > { %848 = shalt.err (!%p845_p10)
}
 0x1a5   : > { %716 = dma.vmem_to_hbm [thread:$0]  (%p997_p3), %s567_s7, 16, %s569_s8, %s556_s11  }
 0x1a6 PF: > { %p722_p11 = scmp.ge.s32.totalorder %s915_s25, 2  ;;  %s580_s22 = sand.u32 1, %s887_s18  }
 0x1a7   : > { %s581_s10 = scalar_lea.sflag [#allocation4], %s580_s22 }
 0x1a8   : > { %p719_p12 = pnand %p722_p11, %p1007_p9 }
 0x1aa   : > { %p720_p13 = pneg %p719_p12 }
 0x1ac   : > { %882 = dma.done.wait (%p720_p13), %s581_s10, 16  }
 0x1ad   : > { %884 = vsyncadd (%p720_p13), %s581_s10, 4294967280  ;;  %s18_s25 = sadd.s32 1, %s915_s25   ;;  %s1214_s18 = smov %s891_s19 }
 0x1ae   : > { %p15_p0 = scmp.ge.s32.totalorder %s18_s25, 6   ;;  %s1215_s19 = smov %s895_s20 }
 0x1af   : > { %s1216_s20 = smov %s1015_s9  ;;  %s1217_s21 = smov %s907_s23 }
 0x1b0   : > { %s1218_s22 = smov %s911_s24  ;;  %s1219_s23 = smov %s1222_s28 }
 0x1b1   : > { %s1220_s24 = smov %s1226_s29  ;;  %17 = sbr.rel (!%p15_p0) target bundleno = 5 (0x5), region = 83 }
 0x1b6   :  { %586 = vsyncpa [#allocation4], 1 }
 0x1b7   :  { %588 = vsyncpa [#allocation4 + $0x1], 1 }

</bundles_post_ra>
